<compile_context>
chip_gen: v6e
topology: v6e:2x2x1
jax: 0.10.0
libtpu: 0.0.40
codegen_flags: <defaults>
</compile_context>

<pallas_src>
import math
from functools import partial

import jax
import jax.numpy as jnp
from jax.experimental import pallas as pl
from jax.experimental.pallas import tpu as pltpu


def fused_lstm_step_kernel(num_layers, x_ref, h_ref, c_ref, *rest):
    """One LSTM time step over all stacked layers; everything lives in VMEM.

    rest = (w_cat_ref_0, ..., w_cat_ref_{L-1}, out_ref, h_out_ref, c_out_ref)
    w_cat_ref_l : (D_in_l + H, 4H) pre-transposed + pre-concatenated weights.
    Gate order along the 4H axis is PyTorch's [i, f, g, o].
    """
    w_refs = rest[:num_layers]
    out_ref, h_out_ref, c_out_ref = rest[num_layers:]
    H = h_ref.shape[-1]

    inp = x_ref[...].astype(jnp.float32)              # (B, D_in)
    for layer in range(num_layers):                   # unrolled at trace time
        h = h_ref[layer].astype(jnp.float32)          # (B, H)
        c = c_ref[layer].astype(jnp.float32)          # (B, H)

        # Single MXU pass: [x | h] @ W_cat  -> (B, 4H)
        xh = jnp.concatenate([inp, h], axis=-1)       # (B, D_in_l + H)
        gates = jnp.dot(xh, w_refs[layer][...],
                        preferred_element_type=jnp.float32)

        # Two full-width EUP passes over (B, 4H), slice the activated values.
        sig = jax.nn.sigmoid(gates)
        tnh = jnp.tanh(gates)
        i_g = sig[:, 0 * H:1 * H]
        f_g = sig[:, 1 * H:2 * H]
        g_g = tnh[:, 2 * H:3 * H]
        o_g = sig[:, 3 * H:4 * H]

        c_new = f_g * c + i_g * g_g
        h_new = o_g * jnp.tanh(c_new)

        h_out_ref[layer] = h_new.astype(h_out_ref.dtype)
        c_out_ref[layer] = c_new.astype(c_out_ref.dtype)
        inp = h_new
        # TODO(synk): inter-layer dropout (drop_prob_lm) is identity in eval mode; omitted.

    out_ref[...] = inp.astype(out_ref.dtype)


def rnn_unit_forward(xt, state, w_cat):
    """Equivalent of RNNUnit.forward for rnn_type='lstm' (one time step).

    xt:     (B, input_size)
    state:  (h, c), each (num_layers, B, rnn_size)
    w_cat:  list per layer of packed weights (D_in_l + rnn_size, 4*rnn_size)
    returns (output, (h_new, c_new)), output = (B, rnn_size)
    """
    h0, c0 = state
    num_layers, B, H = h0.shape
    vmem = pl.BlockSpec(memory_space=pltpu.MemorySpace.VMEM)
    out, h_new, c_new = pl.pallas_call(
        partial(fused_lstm_step_kernel, num_layers),
        out_shape=(jax.ShapeDtypeStruct((B, H), xt.dtype),
                   jax.ShapeDtypeStruct((num_layers, B, H), h0.dtype),
                   jax.ShapeDtypeStruct((num_layers, B, H), c0.dtype)),
        in_specs=[vmem] * (3 + num_layers),
        out_specs=(vmem, vmem, vmem),
    )(xt, h0, c0, *w_cat)
    # TODO(synk): if this unit is driven by a per-step decode loop, fuse the
    # time loop into the kernel too (weights/state resident in VMEM across
    # steps, input_output_aliases on the state) for the next big win.
    return out, (h_new, c_new)


def init_packed_params(key, input_size, rnn_size, num_layers, dtype=jnp.float32):
    """PyTorch uniform(-1/sqrt(H), 1/sqrt(H)) init, packed ONCE at init:
    W_cat[l] = concat([w_ih_l.T, w_hh_l.T], axis=0) -> (D_in_l + H, 4H)."""
    bound = 1.0 / math.sqrt(rnn_size)
    w_cat = []
    for layer in range(num_layers):
        d_in = input_size if layer == 0 else rnn_size
        key, k1, k2 = jax.random.split(key, 3)
        w_ih = jax.random.uniform(k1, (4 * rnn_size, d_in), dtype,
                                  minval=-bound, maxval=bound)
        w_hh = jax.random.uniform(k2, (4 * rnn_size, rnn_size), dtype,
                                  minval=-bound, maxval=bound)
        w_cat.append(jnp.concatenate([w_ih.T, w_hh.T], axis=0))
    return w_cat


def lstm_reference(xt, h0, c0, w_cat):
    """Pure-JAX reference for the same fused step (sanity check)."""
    H = h0.shape[-1]
    inp = xt
    hs, cs = [], []
    for layer in range(h0.shape[0]):
        xh = jnp.concatenate([inp, h0[layer]], axis=-1)
        gates = xh @ w_cat[layer]
        i_g = jax.nn.sigmoid(gates[:, 0 * H:1 * H])
        f_g = jax.nn.sigmoid(gates[:, 1 * H:2 * H])
        g_g = jnp.tanh(gates[:, 2 * H:3 * H])
        o_g = jax.nn.sigmoid(gates[:, 3 * H:4 * H])
        c_new = f_g * c0[layer] + i_g * g_g
        h_new = o_g * jnp.tanh(c_new)
        hs.append(h_new)
        cs.append(c_new)
        inp = h_new
    return inp, jnp.stack(hs), jnp.stack(cs)


if __name__ == "__main__":
    # opt: rnn_type='lstm', rnn_size=32, num_layers=2, drop_prob_lm=0.5,
    #      model_type='concat', input_encoding_size=16, video_encoding_size=16
    batch = 2
    rnn_size = 32
    num_layers = 2
    input_encoding_size = 16
    video_encoding_size = 16
    input_size = input_encoding_size + video_encoding_size  # 'concat' model_type

    key = jax.random.PRNGKey(0)
    key, kx, kh, kc, kp = jax.random.split(key, 5)

    xt = jax.random.normal(kx, (batch, input_size), jnp.float32)
    h0 = jax.random.normal(kh, (num_layers, batch, rnn_size), jnp.float32)
    c0 = jax.random.normal(kc, (num_layers, batch, rnn_size), jnp.float32)
    w_cat = init_packed_params(kp, input_size, rnn_size, num_layers)

    fwd = jax.jit(rnn_unit_forward)
    output, (h1, c1) = fwd(xt, (h0, c0), w_cat)
    jax.block_until_ready((output, h1, c1))

    assert output.shape == (batch, rnn_size)
    assert h1.shape == (num_layers, batch, rnn_size)
    assert c1.shape == (num_layers, batch, rnn_size)

    # Numerical sanity check against a pure-JAX reference of the same math.
    out_r, h_r, c_r = lstm_reference(xt, h0, c0, w_cat)
    assert jnp.allclose(output, out_r, atol=1e-5, rtol=1e-5)
    assert jnp.allclose(h1, h_r, atol=1e-5, rtol=1e-5)
    assert jnp.allclose(c1, c_r, atol=1e-5, rtol=1e-5)

    print("KERNEL_OK")
</pallas_src>

<mosaic_0001>
module attributes {stable_mosaic.version = 11 : i64} {
  func.func @fused_lstm_step_kernel(%arg0: memref<2x32xf32, #tpu.memory_space<vmem>>, %arg1: memref<2x2x32xf32, #tpu.memory_space<vmem>>, %arg2: memref<2x2x32xf32, #tpu.memory_space<vmem>>, %arg3: memref<64x128xf32, #tpu.memory_space<vmem>>, %arg4: memref<64x128xf32, #tpu.memory_space<vmem>>, %arg5: memref<2x32xf32, #tpu.memory_space<vmem>>, %arg6: memref<2x2x32xf32, #tpu.memory_space<vmem>>, %arg7: memref<2x2x32xf32, #tpu.memory_space<vmem>>) attributes {dimension_semantics = [], scalar_prefetch = 0 : i64, scratch_operands = 0 : i64, tpu.core_type = #tpu.core_type<tc>} {
    %c0 = arith.constant 0 : index
    %c0_0 = arith.constant 0 : index
    %0 = vector.load %arg0[%c0, %c0_0] : memref<2x32xf32, #tpu.memory_space<vmem>>, vector<2x32xf32>
    %c0_1 = arith.constant 0 : index
    %c0_2 = arith.constant 0 : index
    %c0_3 = arith.constant 0 : index
    %1 = vector.load %arg1[%c0_1, %c0_2, %c0_3] : memref<2x2x32xf32, #tpu.memory_space<vmem>>, vector<1x2x32xf32>
    %2 = vector.shape_cast %1 : vector<1x2x32xf32> to vector<2x32xf32>
    %c0_4 = arith.constant 0 : index
    %c0_5 = arith.constant 0 : index
    %c0_6 = arith.constant 0 : index
    %3 = vector.load %arg2[%c0_4, %c0_5, %c0_6] : memref<2x2x32xf32, #tpu.memory_space<vmem>>, vector<1x2x32xf32>
    %4 = vector.shape_cast %3 : vector<1x2x32xf32> to vector<2x32xf32>
    %5 = tpu.concatenate %0, %2 in 1 : vector<2x32xf32>, vector<2x32xf32> -> vector<2x64xf32>
    %c0_7 = arith.constant 0 : index
    %c0_8 = arith.constant 0 : index
    %6 = vector.load %arg3[%c0_7, %c0_8] : memref<64x128xf32, #tpu.memory_space<vmem>>, vector<64x128xf32>
    %cst = arith.constant dense<0.000000e+00> : vector<2x128xf32>
    %7 = tpu.matmul %5, %6, %cst {dimension_numbers = #tpu.dot_dimension_numbers<[1], [0], [0], [1], [0, 0, 1, 1], [], []>} : vector<2x64xf32>, vector<64x128xf32>, vector<2x128xf32> -> vector<2x128xf32>
    %8 = arith.negf %7 : vector<2x128xf32>
    %9 = math.exp %8 : vector<2x128xf32>
    %cst_9 = arith.constant 1.000000e+00 : f32
    %10 = vector.broadcast %cst_9 : f32 to vector<2x128xf32>
    %11 = arith.addf %10, %9 : vector<2x128xf32>
    %12 = arith.divf %10, %11 : vector<2x128xf32>
    %13 = math.tanh %7 : vector<2x128xf32>
    %14 = vector.extract_strided_slice %12 {offsets = [0, 0], sizes = [2, 32], strides = [1, 1]} : vector<2x128xf32> to vector<2x32xf32>
    %15 = vector.extract_strided_slice %12 {offsets = [0, 32], sizes = [2, 32], strides = [1, 1]} : vector<2x128xf32> to vector<2x32xf32>
    %16 = vector.extract_strided_slice %13 {offsets = [0, 64], sizes = [2, 32], strides = [1, 1]} : vector<2x128xf32> to vector<2x32xf32>
    %17 = vector.extract_strided_slice %12 {offsets = [0, 96], sizes = [2, 32], strides = [1, 1]} : vector<2x128xf32> to vector<2x32xf32>
    %18 = arith.mulf %15, %4 : vector<2x32xf32>
    %19 = arith.mulf %14, %16 : vector<2x32xf32>
    %20 = arith.addf %18, %19 : vector<2x32xf32>
    %21 = math.tanh %20 : vector<2x32xf32>
    %22 = arith.mulf %17, %21 : vector<2x32xf32>
    %c0_10 = arith.constant 0 : index
    %c0_11 = arith.constant 0 : index
    %c0_12 = arith.constant 0 : index
    %23 = vector.load %arg6[%c0_10, %c0_11, %c0_12] : memref<2x2x32xf32, #tpu.memory_space<vmem>>, vector<1x2x32xf32>
    %24 = vector.shape_cast %23 : vector<1x2x32xf32> to vector<2x32xf32>
    %25 = vector.shape_cast %22 : vector<2x32xf32> to vector<1x2x32xf32>
    tpu.vector_store %arg6[%c0_10, %c0_11, %c0_12], %25 {strides = array<i32>} : memref<2x2x32xf32, #tpu.memory_space<vmem>>, vector<1x2x32xf32>,
    %c0_13 = arith.constant 0 : index
    %c0_14 = arith.constant 0 : index
    %c0_15 = arith.constant 0 : index
    %26 = vector.load %arg7[%c0_13, %c0_14, %c0_15] : memref<2x2x32xf32, #tpu.memory_space<vmem>>, vector<1x2x32xf32>
    %27 = vector.shape_cast %26 : vector<1x2x32xf32> to vector<2x32xf32>
    %28 = vector.shape_cast %20 : vector<2x32xf32> to vector<1x2x32xf32>
    tpu.vector_store %arg7[%c0_13, %c0_14, %c0_15], %28 {strides = array<i32>} : memref<2x2x32xf32, #tpu.memory_space<vmem>>, vector<1x2x32xf32>,
    %c1 = arith.constant 1 : index
    %c0_16 = arith.constant 0 : index
    %c0_17 = arith.constant 0 : index
    %29 = vector.load %arg1[%c1, %c0_16, %c0_17] : memref<2x2x32xf32, #tpu.memory_space<vmem>>, vector<1x2x32xf32>
    %30 = vector.shape_cast %29 : vector<1x2x32xf32> to vector<2x32xf32>
    %c1_18 = arith.constant 1 : index
    %c0_19 = arith.constant 0 : index
    %c0_20 = arith.constant 0 : index
    %31 = vector.load %arg2[%c1_18, %c0_19, %c0_20] : memref<2x2x32xf32, #tpu.memory_space<vmem>>, vector<1x2x32xf32>
    %32 = vector.shape_cast %31 : vector<1x2x32xf32> to vector<2x32xf32>
    %33 = tpu.concatenate %22, %30 in 1 : vector<2x32xf32>, vector<2x32xf32> -> vector<2x64xf32>
    %c0_21 = arith.constant 0 : index
    %c0_22 = arith.constant 0 : index
    %34 = vector.load %arg4[%c0_21, %c0_22] : memref<64x128xf32, #tpu.memory_space<vmem>>, vector<64x128xf32>
    %cst_23 = arith.constant dense<0.000000e+00> : vector<2x128xf32>
    %35 = tpu.matmul %33, %34, %cst_23 {dimension_numbers = #tpu.dot_dimension_numbers<[1], [0], [0], [1], [0, 0, 1, 1], [], []>} : vector<2x64xf32>, vector<64x128xf32>, vector<2x128xf32> -> vector<2x128xf32>
    %36 = arith.negf %35 : vector<2x128xf32>
    %37 = math.exp %36 : vector<2x128xf32>
    %cst_24 = arith.constant 1.000000e+00 : f32
    %38 = vector.broadcast %cst_24 : f32 to vector<2x128xf32>
    %39 = arith.addf %38, %37 : vector<2x128xf32>
    %40 = arith.divf %38, %39 : vector<2x128xf32>
    %41 = math.tanh %35 : vector<2x128xf32>
    %42 = vector.extract_strided_slice %40 {offsets = [0, 0], sizes = [2, 32], strides = [1, 1]} : vector<2x128xf32> to vector<2x32xf32>
    %43 = vector.extract_strided_slice %40 {offsets = [0, 32], sizes = [2, 32], strides = [1, 1]} : vector<2x128xf32> to vector<2x32xf32>
    %44 = vector.extract_strided_slice %41 {offsets = [0, 64], sizes = [2, 32], strides = [1, 1]} : vector<2x128xf32> to vector<2x32xf32>
    %45 = vector.extract_strided_slice %40 {offsets = [0, 96], sizes = [2, 32], strides = [1, 1]} : vector<2x128xf32> to vector<2x32xf32>
    %46 = arith.mulf %43, %32 : vector<2x32xf32>
    %47 = arith.mulf %42, %44 : vector<2x32xf32>
    %48 = arith.addf %46, %47 : vector<2x32xf32>
    %49 = math.tanh %48 : vector<2x32xf32>
    %50 = arith.mulf %45, %49 : vector<2x32xf32>
    %c1_25 = arith.constant 1 : index
    %c0_26 = arith.constant 0 : index
    %c0_27 = arith.constant 0 : index
    %51 = vector.load %arg6[%c1_25, %c0_26, %c0_27] : memref<2x2x32xf32, #tpu.memory_space<vmem>>, vector<1x2x32xf32>
    %52 = vector.shape_cast %51 : vector<1x2x32xf32> to vector<2x32xf32>
    %53 = vector.shape_cast %50 : vector<2x32xf32> to vector<1x2x32xf32>
    tpu.vector_store %arg6[%c1_25, %c0_26, %c0_27], %53 {strides = array<i32>} : memref<2x2x32xf32, #tpu.memory_space<vmem>>, vector<1x2x32xf32>,
    %c1_28 = arith.constant 1 : index
    %c0_29 = arith.constant 0 : index
    %c0_30 = arith.constant 0 : index
    %54 = vector.load %arg7[%c1_28, %c0_29, %c0_30] : memref<2x2x32xf32, #tpu.memory_space<vmem>>, vector<1x2x32xf32>
    %55 = vector.shape_cast %54 : vector<1x2x32xf32> to vector<2x32xf32>
    %56 = vector.shape_cast %48 : vector<2x32xf32> to vector<1x2x32xf32>
    tpu.vector_store %arg7[%c1_28, %c0_29, %c0_30], %56 {strides = array<i32>} : memref<2x2x32xf32, #tpu.memory_space<vmem>>, vector<1x2x32xf32>,
    %c0_31 = arith.constant 0 : index
    %c0_32 = arith.constant 0 : index
    %57 = vector.load %arg5[%c0_31, %c0_32] : memref<2x32xf32, #tpu.memory_space<vmem>>, vector<2x32xf32>
    tpu.vector_store %arg5[%c0_31, %c0_32], %50 {strides = array<i32>} : memref<2x32xf32, #tpu.memory_space<vmem>>, vector<2x32xf32>,
    return
  }
}

</mosaic_0001>

<bundles_post_ra>
// kernel: rnn_unit_forward.1
= control target key start
LH: loop header
LB: loop body
LE: loop exit
PB: predicated region body
PF: predicated region fallthrough
CT: control target
= control target key end

     0   :  { %13 = vsyncpa [#allocation3], 0  ;;  %s806_s0 = inlined_call_operand.hbm [shape: f32[2,32], index: 0, kind: input, shape index: {}]   ;;  %s807_s1 = inlined_call_operand.hbm [shape: f32[2,2,32], index: 1, kind: input, shape index: {}]   ;;  %s808_s2 = inlined_call_operand.hbm [shape: f32[2,2,32], index: 2, kind: input, shape index: {}]   ;;  %s809_s3 = inlined_call_operand.hbm [shape: f32[64,128], index: 3, kind: input, shape index: {}]   ;;  %s810_s4 = inlined_call_operand.hbm [shape: f32[64,128], index: 4, kind: input, shape index: {}]   ;;  %s811_s5 = inlined_call_operand.hbm [shape: f32[2,32], index: 5, kind: output, shape index: {0}]   ;;  %s812_s6 = inlined_call_operand.hbm [shape: f32[2,2,32], index: 6, kind: output, shape index: {1}]   ;;  %s813_s7 = inlined_call_operand.hbm [shape: f32[2,2,32], index: 7, kind: output, shape index: {2}]  }
   0x1   :  { %14 = vsyncpa [#allocation6], 0 }
   0x2   :  { %15 = vsyncpa [#allocation9], 0 }
   0x3   :  { %16 = vsyncpa [#allocation4], 0 }
   0x4   :  { %17 = vsyncpa [#allocation13], 0  ;;  %s662_s24 = smov [#allocation5]  }
   0x5   :  { %s33_s25 = sshll.u32 %s662_s24, 4  ;;  %s34_s25 = int_to_ptr.vmem [resolvable:$true] %s33_s25 }
   0x6   :  { %s500_s26 = scalar_lea.vmem %s34_s25, 64  ;;  %p505_p1 = scmp.lt.s32.totalorder %s34_s25, %s34_s25 }
   0x7   :  { %p501_p0 = scmp.ne.s32.totalorder %s34_s25, %s500_s26  ;;  %p506_p2 = scmp.lt.s32.totalorder %s500_s26, %s500_s26 }
   0x9   :  { %p507_p3 = por %p506_p2, %p505_p1 }
   0xb   :  { %p508_p4 = pnand %p507_p3, %p501_p0 }
   0xd   :  { %511 = shalt.err (!%p508_p4)
}
   0xe   :  { %s663_s27 = smov 32   ;;  %s664_s28 = smov 2  }
   0xf   :  { %39 = dma.hbm_to_vmem [thread:$0]  %s807_s1, 64, %s34_s25, [#allocation6], %s663_s27, %s663_s27, %s664_s28  }
  0x10   :  { %s665_s8 = smov [#allocation8]  }
  0x11   :  { %s57_s9 = sshll.u32 %s665_s8, 4  ;;  %s58_s9 = int_to_ptr.vmem [resolvable:$true] %s57_s9 }
  0x12   :  { %s520_s10 = scalar_lea.vmem %s58_s9, 1024  ;;  %p525_p6 = scmp.lt.s32.totalorder %s58_s9, %s58_s9 }
  0x13   :  { %p521_p5 = scmp.ne.s32.totalorder %s58_s9, %s520_s10  ;;  %p526_p7 = scmp.lt.s32.totalorder %s520_s10, %s520_s10 }
  0x15   :  { %p527_p8 = por %p526_p7, %p525_p6 }
  0x17   :  { %p528_p9 = pnand %p527_p8, %p521_p5 }
  0x19   :  { %531 = shalt.err (!%p528_p9)
}
  0x1a   :  { %s666_s11 = smov 128   ;;  %s667_s12 = smov 8  }
  0x1b   :  { %63 = dma.hbm_to_vmem [thread:$0]  %s809_s3, 1024, %s58_s9, [#allocation9], %s666_s11, %s666_s11, %s667_s12  }
  0x1c   :  { %s668_s1 = smov [#allocation2]   ;;  %s669_s16 = smov [#allocation7]  }
  0x1d   :  { %s24_s15 = sshll.u32 %s668_s1, 4  ;;  %s45_s17 = sshll.u32 %s669_s16, 4  ;;  %s25_s15 = int_to_ptr.vmem [resolvable:$true] %s24_s15  ;;  %s46_s17 = int_to_ptr.vmem [resolvable:$true] %s45_s17 }
  0x1e   :  { %s540_s18 = scalar_lea.vmem %s25_s15, 32  ;;  %p545_p11 = scmp.lt.s32.totalorder %s25_s15, %s25_s15 }
  0x1f   :  { %p541_p10 = scmp.ne.s32.totalorder %s25_s15, %s540_s18  ;;  %p546_p12 = scmp.lt.s32.totalorder %s540_s18, %s540_s18 }
  0x21   :  { %p547_p13 = por %p546_p12, %p545_p11 }
  0x23   :  { %p548_p0 = pnand %p547_p13, %p541_p10 }
  0x25   :  { %551 = shalt.err (!%p548_p0)
}
  0x26   :  { %27 = dma.hbm_to_vmem [thread:$0]  %s806_s0, 32, %s25_s15, [#allocation3]  }
  0x27   :  { %s560_s21 = scalar_lea.vmem %s46_s17, 64  ;;  %p565_p2 = scmp.lt.s32.totalorder %s46_s17, %s46_s17 }
  0x28   :  { %p561_p1 = scmp.ne.s32.totalorder %s46_s17, %s560_s21  ;;  %p566_p3 = scmp.lt.s32.totalorder %s560_s21, %s560_s21 }
  0x2a   :  { %p567_p4 = por %p566_p3, %p565_p2 }
  0x2c   :  { %p568_p5 = pnand %p567_p4, %p561_p1 }
  0x2e   :  { %571 = shalt.err (!%p568_p5)
}
  0x2f   :  { %51 = dma.hbm_to_vmem [thread:$0]  %s808_s2, 64, %s46_s17, [#allocation6], %s663_s27, %s663_s27, %s664_s28  }
  0x30   :  { %s670_s23 = smov [#allocation10]  }
  0x31   :  { %s69_s24 = sshll.u32 %s670_s23, 4  ;;  %s70_s24 = int_to_ptr.vmem [resolvable:$true] %s69_s24 }
  0x32   :  { %s580_s25 = scalar_lea.vmem %s70_s24, 1024  ;;  %p585_p7 = scmp.lt.s32.totalorder %s70_s24, %s70_s24 }
  0x33   :  { %p581_p6 = scmp.ne.s32.totalorder %s70_s24, %s580_s25  ;;  %p586_p8 = scmp.lt.s32.totalorder %s580_s25, %s580_s25 }
  0x35   :  { %p587_p9 = por %p586_p8, %p585_p7 }
  0x37   :  { %p588_p10 = pnand %p587_p9, %p581_p6 }
  0x39   :  { %591 = shalt.err (!%p588_p10)
}
  0x3a   :  { %75 = dma.hbm_to_vmem [thread:$0]  %s810_s4, 1024, %s70_s24, [#allocation9], %s666_s11, %s666_s11, %s667_s12  }
  0x3b   :  { %652 = dma.done.wait [#allocation3], 32  }
  0x3c   :  { %653 = vsyncadd [#allocation3], 4294967264 }
  0x3d   :  { %654 = dma.done.wait [#allocation6], 128  }
  0x3e   :  { %655 = vsyncadd [#allocation6], 4294967168 }
  0x3f   :  { %656 = dma.done.wait [#allocation9], 2048  }
  0x40   :  { %657 = vsyncadd [#allocation9], 4294965248  ;;  %v671_v0 = vmov 0.0   ;;  %vm672_vm0 = vmmov 0   ;;  %v92_v1 = vld [vmem:[#allocation5] sm:$0x3] }
  0x41   :  { %422 = vmatprep.subr.mxu0 %v671_v0  ;;  %438 = vmatprep.mubr.msk.f32.mxu0 %vm672_vm0, %v671_v0  ;;  %v107_v2 = vld [vmem:[#allocation8 + $0x38] sm:$0xff]  ;;  %v106_v3 = vld [vmem:[#allocation8 + $0x30] sm:$0xff]  ;;  %v105_v4 = vld [vmem:[#allocation8 + $0x28] sm:$0xff]  ;;  %vm98_vm1 = vcmask 261120   ;;  %vm108_vm2 = vcmask 523264   ;;  %s673_s2 = smov 64  }
  0x42   :  { %441 = vmatprep.subr.mxu1 %v671_v0  ;;  %457 = vmatprep.mubr.msk.f32.mxu1 %vm672_vm0, %v671_v0  ;;  %v93_v5 = vld [vmem:[#allocation7] sm:$0x3]  ;;  %v104_v6 = vld [vmem:[#allocation8 + $0x20] sm:$0xff]  ;;  %v102_v8 = vld [vmem:[#allocation8 + $0x10] sm:$0xff]  ;;  %vm214_vm3 = vcmask 254976   ;;  %s674_s4 = smov 96  }
  0x43   :  { %95 = vrot.lane.b32.xlu0 %v92_v1, %s663_s27  ;;  %423 = vmatpush3.msra.mxu0 %v107_v2  ;;  %v103_v7 = vld [vmem:[#allocation8 + $0x18] sm:$0xff]  ;;  %v101_v9 = vld [vmem:[#allocation8 + $0x8] sm:$0xff]  ;;  %v100_v10 = vld [vmem:[#allocation8] sm:$0xff]  ;;  %s675_s29 = smov [#allocation12]   ;;  %s676_s8 = smov [#allocation11]  }
  0x44   :  { %424 = vmatprep.subr.mxu0 %v671_v0  ;;  %190 = vrot.lane.b32.xlu1 %v93_v5, %s663_s27  ;;  %v91_v11 = vld [vmem:[#allocation2] sm:$0x3]  ;;  %v237_v27 = vld [vmem:[#allocation10 + $0x38] sm:$0xff]  ;;  %v235_v29 = vld [vmem:[#allocation10 + $0x28] sm:$0xff]  ;;  %s367_s30 = sshll.u32 %s675_s29, 4  ;;  %s358_s9 = sshll.u32 %s676_s8, 4  ;;  %s368_s30 = int_to_ptr.vmem [resolvable:$true] %s367_s30  ;;  %s359_s9 = int_to_ptr.vmem [resolvable:$true] %s358_s9 }
  0x45   :  { %425 = vmatpush3.msra.mxu0 %v106_v3  ;;  %v236_v28 = vld [vmem:[#allocation10 + $0x30] sm:$0xff]  ;;  %442 = vmatpush3.msra.mxu1 %v237_v27  ;;  %v234_v30 = vld [vmem:[#allocation10 + $0x20] sm:$0xff]  ;;  %v233_v31 = vld [vmem:[#allocation10 + $0x18] sm:$0xff]  ;;  %s677_s10 = smov [#allocation14]   ;;  %s592_s12 = scalar_lea.vmem %s368_s30, 64 }
  0x46   :  { %426 = vmatprep.subr.mxu0 %v671_v0  ;;  %443 = vmatprep.subr.mxu1 %v671_v0  ;;  %v232_v32 = vld [vmem:[#allocation10 + $0x10] sm:$0xff]  ;;  %v231_v34 = vld [vmem:[#allocation10 + $0x8] sm:$0xff]  ;;  %v222_v35 = vld [vmem:[#allocation5 + $0x2] sm:$0x3]  ;;  %s379_s11 = sshll.u32 %s677_s10, 4  ;;  %p593_p11 = scmp.ne.s32.totalorder %s368_s30, %s592_s12  ;;  %s783_s11 = int_to_ptr.vmem [resolvable:$true] %s379_s11 }
  0x47   :  { %427 = vmatpush3.msra.mxu0 %v105_v4  ;;  %444 = vmatpush3.msra.mxu1 %v236_v28  ;;  %v230_v36 = vld [vmem:[#allocation10] sm:$0xff]  ;;  %v224_v37 = vld [vmem:[#allocation7 + $0x2] sm:$0x3]  ;;  %p597_p12 = scmp.lt.s32.totalorder %s368_s30, %s368_s30  ;;  %p598_p13 = scmp.lt.s32.totalorder %s592_s12, %s592_s12 }
  0x48   :  { %428 = vmatprep.subr.mxu0 %v671_v0  ;;  %445 = vmatprep.subr.mxu1 %v671_v0 }
  0x49   :  { %429 = vmatpush3.msra.mxu0 %v104_v6  ;;  %446 = vmatpush3.msra.mxu1 %v235_v29  ;;  %p599_p0 = por %p598_p13, %p597_p12 }
  0x4a   :  { %430 = vmatprep.subr.mxu0 %v671_v0  ;;  %447 = vmatprep.subr.mxu1 %v671_v0 }
  0x4b   :  { %431 = vmatpush3.msra.mxu0 %v103_v7  ;;  %448 = vmatpush3.msra.mxu1 %v234_v30  ;;  %p600_p1 = pnand %p599_p0, %p593_p11 }
  0x4c   :  { %432 = vmatprep.subr.mxu0 %v671_v0  ;;  %449 = vmatprep.subr.mxu1 %v671_v0 }
  0x4d   :  { %433 = vmatpush3.msra.mxu0 %v102_v8  ;;  %450 = vmatpush3.msra.mxu1 %v233_v31 }
  0x4e   :  { %434 = vmatprep.subr.mxu0 %v671_v0  ;;  %451 = vmatprep.subr.mxu1 %v671_v0 }
  0x4f   :  { %435 = vmatpush3.msra.mxu0 %v101_v9  ;;  %452 = vmatpush3.msra.mxu1 %v232_v32 }
  0x50   :  { %436 = vmatprep.subr.mxu0 %v671_v0  ;;  %453 = vmatprep.subr.mxu1 %v671_v0 }
  0x51   :  { %437 = vmatpush3.msra.mxu0 %v100_v10  ;;  %454 = vmatpush3.msra.mxu1 %v231_v34 }
  0x52   :  { %455 = vmatprep.subr.mxu1 %v671_v0 }
  0x53   :  { %456 = vmatpush3.msra.mxu1 %v230_v36 }
  0xb5   :  { %v96_v12 = vpop.permute.xlu0 %95 }
  0xb6   :  { %v99_v13 = vsel %vm98_vm1, %v91_v11, %v96_v12  ;;  %v191_v23 = vpop.permute.xlu1 %190 }
  0xb7   :  { %439 = vmatmul.mubr.msk.f32.vlgmr.msra.gmra.mxu0 %vm108_vm2, %v99_v13 }
 0x177   :  { %v178_v14 = vpop.f32.mrf.mxu0 }
 0x178   :  { %476 = vtanh.f32 %v178_v14  ;;  %v401_v17 = vmul.f32 -1.442695, %v178_v14 }
 0x179   :  { %v440_v15 = vpop.f32.mrf.mxu0 }
 0x17a   :  { %478 = vpow2.f32 %v401_v17 }
 0x185   :  { %v477_v16 = vpop.eup %476 }
 0x186   :  { %195 = vrot.lane.b32.xlu0 %v477_v16, %s673_s2 }
 0x187   :  { %v479_v18 = vpop.eup %478 }
 0x188   :  { %v185_v19 = vadd.f32 1.0, %v479_v18 }
 0x18a   :  { %480 = vrcp.f32 %v185_v19 }
 0x197   :  { %v481_v20 = vpop.eup %480 }
 0x198   :  { %v193_v24 = vmul.f32 %v481_v20, %v191_v23 }
 0x1f8   :  { %v196_v21 = vpop.permute.xlu0 %195 }
 0x1f9   :  { %v198_v22 = vmul.f32 %v481_v20, %v196_v21 }
 0x1fb   :  { %200 = vrot.lane.b32.xlu1 %v198_v22, %s663_s27 }
 0x26d   :  { %v201_v25 = vpop.permute.xlu1 %200 }
 0x26e   :  { %v203_v26 = vadd.f32 %v201_v25, %v193_v24 }
 0x270   :  { %482 = vtanh.f32 %v203_v26 }
 0x27d   :  { %v483_v33 = vpop.eup %482 }
 0x27e   :  { %206 = vrot.lane.b32.xlu0 %v483_v33, %s673_s2 }
 0x282   :  { %226 = vrot.lane.b32.xlu0 %v222_v35, %s663_s27 }
 0x286   :  { %319 = vrot.lane.b32.xlu0 %v224_v37, %s663_s27 }
 0x2f0   :  { %v207_v38 = vpop.permute.xlu0 %206 }
 0x2f1   :  { %v209_v39 = vmul.f32 %v481_v20, %v207_v38 }
 0x2f3   :  { %211 = vrot.lane.b32.xlu1 %v209_v39, %s663_s27 }
 0x2f4   :  { %v227_v40 = vpop.permute.xlu0 %226 }
 0x2f8   :  { %v320_v52 = vpop.permute.xlu0 %319 }
 0x365   :  { %v212_v41 = vpop.permute.xlu1 %211 }
 0x366   :  { %215 = vst.msk [vmem:[#allocation12] sm:$0x3] %vm214_vm3, %v212_v41  ;;  %v229_v42 = vsel %vm98_vm1, %v212_v41, %v227_v40 }
 0x367   :  { %458 = vmatmul.mubr.msk.f32.vlgmr.msra.gmra.mxu1 %vm108_vm2, %v229_v42 }
 0x427   :  { %v307_v43 = vpop.f32.mrf.mxu1 }
 0x428   :  { %484 = vtanh.f32 %v307_v43  ;;  %v403_v46 = vmul.f32 -1.442695, %v307_v43 }
 0x429   :  { %v459_v44 = vpop.f32.mrf.mxu1 }
 0x42a   :  { %486 = vpow2.f32 %v403_v46 }
 0x435   :  { %v485_v45 = vpop.eup %484 }
 0x436   :  { %324 = vrot.lane.b32.xlu1 %v485_v45, %s673_s2 }
 0x437   :  { %v487_v47 = vpop.eup %486 }
 0x438   :  { %v314_v48 = vadd.f32 1.0, %v487_v47 }
 0x43a   :  { %488 = vrcp.f32 %v314_v48 }
 0x447   :  { %v489_v49 = vpop.eup %488 }
 0x448   :  { %v322_v53 = vmul.f32 %v489_v49, %v320_v52 }
 0x4a8   :  { %v325_v50 = vpop.permute.xlu1 %324 }
 0x4a9   :  { %v327_v51 = vmul.f32 %v489_v49, %v325_v50 }
 0x4ab   :  { %329 = vrot.lane.b32.xlu1 %v327_v51, %s663_s27 }
 0x51d   :  { %v330_v54 = vpop.permute.xlu1 %329 }
 0x51e   :  { %v332_v55 = vadd.f32 %v330_v54, %v322_v53 }
 0x520   :  { %490 = vtanh.f32 %v332_v55 }
 0x52d   :  { %v491_v56 = vpop.eup %490 }
 0x52e   :  { %335 = vrot.lane.b32.xlu0 %v491_v56, %s673_s2 }
 0x532   :  { %217 = vrot.lane.b32.xlu0 %v203_v26, %s674_s4 }
 0x5a0   :  { %v336_v57 = vpop.permute.xlu0 %335 }
 0x5a1   :  { %v338_v58 = vmul.f32 %v489_v49, %v336_v57 }
 0x5a3   :  { %340 = vrot.lane.b32.xlu1 %v338_v58, %s663_s27 }
 0x5a4   :  { %v218_v59 = vpop.permute.xlu0 %217 }
 0x5a5   :  { %220 = vst.msk [vmem:[#allocation14] sm:$0x3] %vm214_vm3, %v218_v59 }
 0x5a7   :  { %346 = vrot.lane.b32.xlu1 %v332_v55, %s674_s4 }
 0x615   :  { %v341_v60 = vpop.permute.xlu1 %340 }
 0x616   :  { %344 = vst.msk [vmem:[#allocation12 + $0x2] sm:$0x3] %vm214_vm3, %v341_v60  ;;  %351 = vst.msk [vmem:[#allocation11] sm:$0x3] %vm214_vm3, %v341_v60 }
 0x617   :  { %603 = shalt.err (!%p600_p1)
}
 0x618   :  { %373 = dma.vmem_to_hbm [thread:$0]  %s368_s30, 64, %s812_s6, [#allocation13], %s663_s27, %s663_s27, %s664_s28  }
 0x619   :  { %s612_s1 = scalar_lea.vmem %s359_s9, 32  ;;  %p617_p3 = scmp.lt.s32.totalorder %s359_s9, %s359_s9 }
 0x61a   :  { %p613_p2 = scmp.ne.s32.totalorder %s359_s9, %s612_s1  ;;  %p618_p4 = scmp.lt.s32.totalorder %s612_s1, %s612_s1 }
 0x61c   :  { %p619_p5 = por %p618_p4, %p617_p3 }
 0x61e   :  { %p620_p6 = pnand %p619_p5, %p613_p2 }
 0x620   :  { %623 = shalt.err (!%p620_p6)
}
 0x621   :  { %361 = dma.vmem_to_hbm [thread:$0]  %s359_s9, 32, %s811_s5, [#allocation4]   ;;  %v347_v61 = vpop.permute.xlu1 %346 }
 0x622   :  { %350 = vst.msk [vmem:[#allocation14 + $0x2] sm:$0x3] %vm214_vm3, %v347_v61  ;;  %s632_s17 = scalar_lea.vmem %s783_s11, 64  ;;  %p637_p8 = scmp.lt.s32.totalorder %s783_s11, %s783_s11 }
 0x623   :  { %p633_p7 = scmp.ne.s32.totalorder %s783_s11, %s632_s17  ;;  %p638_p9 = scmp.lt.s32.totalorder %s632_s17, %s632_s17 }
 0x625   :  { %p639_p10 = por %p638_p9, %p637_p8 }
 0x627   :  { %p640_p11 = pnand %p639_p10, %p633_p7 }
 0x629   :  { %643 = shalt.err (!%p640_p11)
}
 0x62a   :  { %385 = dma.vmem_to_hbm [thread:$0]  %s783_s11, 64, %s813_s7, [#allocation13], %s663_s27, %s663_s27, %s664_s28  }
 0x62b   :  { %658 = dma.done.wait [#allocation4], 32  }
 0x62c   :  { %659 = vsyncadd [#allocation4], 4294967264 }
 0x62d   :  { %660 = dma.done.wait [#allocation13], 128  }
 0x62e   :  { %661 = vsyncadd [#allocation13], 4294967168 }
 0x62f   :  { %395 = vsyncpa [#allocation3], 1 }
 0x630   :  { %396 = vsyncpa [#allocation6], 1 }
 0x631   :  { %397 = vsyncpa [#allocation9], 1 }
 0x632   :  { %398 = vsyncpa [#allocation4], 1 }
 0x633   :  { %399 = vsyncpa [#allocation13], 1 }

</bundles_post_ra>
